<compile_context>
chip_gen: v7x
topology: tpu7x:2x2x1
jax: 0.10.0
libtpu: 0.0.40
codegen_flags: <defaults>
</compile_context>

<pallas_src>
import jax
import jax.numpy as jnp
import numpy as np
from jax import lax
from jax.experimental import pallas as pl
from jax.experimental.pallas import tpu as pltpu


def _pad_to(n, m):
    return ((n + m - 1) // m) * m


def _proj_pad_dims(K, N):
    """Tile sizes and padded dims for the [K, N] projection weight."""
    Ka = _pad_to(K, 128)
    Na = _pad_to(N, 128)
    tk = min(1024, Ka)          # deep K tile: fewer accumulation grid steps
    tn = min(512, Na)           # >=256 fills the 256-wide MXU on v6e/v7x
    return tk, tn, _pad_to(Ka, tk), _pad_to(Na, tn)


# ----------------------------------------------------------------------------
# Phase 1: hoisted input projection  [M, K] @ [K, N] + bias  (tiled MXU matmul)
#   bf16 operands, f32 accumulation, bf16 output (the streamed gate tensor).
# ----------------------------------------------------------------------------
def _proj_kernel(a_ref, b_ref, bias_ref, o_ref, acc_ref):
    @pl.when(pl.program_id(2) == 0)
    def _():
        acc_ref[...] = jnp.zeros_like(acc_ref)

    acc_ref[...] += jnp.dot(a_ref[...], b_ref[...],
                            preferred_element_type=jnp.float32)

    @pl.when(pl.program_id(2) == pl.num_programs(2) - 1)
    def _():
        o_ref[...] = (acc_ref[...] + bias_ref[...]).astype(o_ref.dtype)


def input_projection(x2d, w_padded, bias_padded, n_out):
    """x2d: [M, K]; w_padded: [Kp, Np] bf16 (pre-padded); bias_padded: [1, Np] f32.

    Returns gates [M, n_out] bf16 (f32-accumulated).
    """
    M, K = x2d.shape
    Kp, Np = w_padded.shape
    # Consistent with _proj_pad_dims: these always divide Kp/Np.
    tk = min(1024, Kp)
    tn = min(512, Np)

    Mp0 = _pad_to(M, 8)
    tm = min(512, Mp0)
    Mp = _pad_to(Mp0, tm)

    if Mp == M and Kp == K:
        a = x2d.astype(jnp.bfloat16)                       # no pad copy needed
    else:
        a = jnp.zeros((Mp, Kp), jnp.bfloat16).at[:M, :K].set(x2d.astype(jnp.bfloat16))

    grid = (Mp // tm, Np // tn, Kp // tk)
    cost = pl.CostEstimate(
        flops=int(2 * Mp * Np * Kp),
        transcendentals=0,
        bytes_accessed=int(2 * Mp * Kp * (Np // tn)        # A re-read per N tile
                           + 2 * Kp * Np * (Mp // tm)      # B re-read per M tile
                           + 2 * Mp * Np                   # bf16 output
                           + 4 * Np * (Mp // tm)),         # bias
    )

    out = pl.pallas_call(
        _proj_kernel,
        out_shape=jax.ShapeDtypeStruct((Mp, Np), jnp.bfloat16),
        grid_spec=pltpu.PrefetchScalarGridSpec(
            num_scalar_prefetch=0,
            grid=grid,
            in_specs=[
                pl.BlockSpec((tm, tk), lambda i, j, k: (i, k)),
                pl.BlockSpec((tk, tn), lambda i, j, k: (k, j)),
                pl.BlockSpec((1, tn), lambda i, j, k: (0, j)),
            ],
            out_specs=pl.BlockSpec((tm, tn), lambda i, j, k: (i, j)),
            scratch_shapes=[pltpu.VMEM((tm, tn), jnp.float32)],
        ),
        compiler_params=pltpu.CompilerParams(
            dimension_semantics=("parallel", "parallel", "arbitrary"),
            vmem_limit_bytes=32 * 1024 * 1024,
        ),
        cost_estimate=cost,
    )(a, w_padded, bias_padded)
    return out[:M, :n_out]


# ----------------------------------------------------------------------------
# Phase 2: masked LSTM recurrence over time chunks + classification head
#   bf16 streamed gates + bf16 resident recurrent weights, f32 gate math,
#   (h, c) for both layers carried in VMEM scratch across grid steps.
# ----------------------------------------------------------------------------
def _make_rnn_kernel(Tc, Bp, H, unroll):
    G = 4 * H

    def kernel(maxlen_ref,                     # scalar-prefetch (SMEM): [1] int32
               gates_ref, len_ref,
               w_hh0_ref, w_ih1_ref, w_hh1_ref, b1_ref,
               bn1_scale_ref, bn1_shift_ref, w_l1_ref, b_l1_ref,
               bn2_scale_ref, bn2_shift_ref, w_l2_ref, b_l2_ref,
               out_ref, h_out_ref,
               h0_s, c0_s, h1_s, c1_s):
        c_idx = pl.program_id(0)
        max_len = maxlen_ref[0]

        @pl.when(c_idx == 0)
        def _():
            h0_s[...] = jnp.zeros_like(h0_s)
            c0_s[...] = jnp.zeros_like(c0_s)
            h1_s[...] = jnp.zeros_like(h1_s)
            c1_s[...] = jnp.zeros_like(c1_s)

        # Skip chunks entirely beyond the longest valid sequence (states frozen anyway).
        @pl.when(c_idx * Tc < max_len)
        def _():
            lengths = len_ref[...]              # [Bp, 1] int32
            w_hh0 = w_hh0_ref[...]              # bf16 [H, 4H], resident
            w_ih1 = w_ih1_ref[...]
            w_hh1 = w_hh1_ref[...]
            # Hoisted broadcast: JAX doesn't CSE broadcast_in_dim, so doing this
            # inside the loop would re-emit it every timestep.
            b1 = jnp.broadcast_to(b1_ref[...], (Bp, G))
            t0 = c_idx * Tc

            def step(t, carry):
                h0, c0, h1, c1 = carry
                # Streamed bf16 gate chunk -> f32 for the gate math.
                g0_pre = gates_ref[t].astype(jnp.float32)   # [Bp, 4H] = x_t @ W_ih0 + b0
                # Layer-1 hidden-hidden push first: independent of this step's layer-0
                # output, so the MXU latency hides under layer-0's EUP/VPU work.
                hh1 = jnp.dot(h1.astype(jnp.bfloat16), w_hh1,
                              preferred_element_type=jnp.float32)
                g0 = g0_pre + jnp.dot(h0.astype(jnp.bfloat16), w_hh0,
                                      preferred_element_type=jnp.float32)
                # PyTorch LSTM gate order: i, f, g, o
                i0 = jax.nn.sigmoid(g0[:, 0 * H:1 * H])
                f0 = jax.nn.sigmoid(g0[:, 1 * H:2 * H])
                z0 = jnp.tanh(g0[:, 2 * H:3 * H])
                o0 = jax.nn.sigmoid(g0[:, 3 * H:4 * H])
                c0n = f0 * c0 + i0 * z0
                h0n = o0 * jnp.tanh(c0n)
                # TODO(synk): LSTM inter-layer dropout(0.5) is train-mode only; eval here.
                g1 = jnp.dot(h0n.astype(jnp.bfloat16), w_ih1,
                             preferred_element_type=jnp.float32) + hh1 + b1
                i1 = jax.nn.sigmoid(g1[:, 0 * H:1 * H])
                f1 = jax.nn.sigmoid(g1[:, 1 * H:2 * H])
                z1 = jnp.tanh(g1[:, 2 * H:3 * H])
                o1 = jax.nn.sigmoid(g1[:, 3 * H:4 * H])
                c1n = f1 * c1 + i1 * z1
                h1n = o1 * jnp.tanh(c1n)
                # packed-sequence semantics: states freeze at/after each row's length.
                mask = (t0 + t) < lengths       # [Bp, 1]
                h0 = jnp.where(mask, h0n, h0)
                c0 = jnp.where(mask, c0n, c0)
                h1 = jnp.where(mask, h1n, h1)
                c1 = jnp.where(mask, c1n, c1)
                return h0, c0, h1, c1

            carry = (h0_s[...], c0_s[...], h1_s[...], c1_s[...])
            h0, c0, h1, c1 = lax.fori_loop(0, Tc, step, carry, unroll=unroll)
            h0_s[...], c0_s[...], h1_s[...], c1_s[...] = h0, c0, h1, c1

        # Head runs once, on the final grid step (outputs are resident; written back at end).
        @pl.when(c_idx == pl.num_programs(0) - 1)
        def _():
            h1 = h1_s[...]
            h_out_ref[...] = h1
            # BatchNorm1d(eval, folded) -> Linear -> BatchNorm1d(eval, folded) -> Linear -> Softmax
            y = h1 * bn1_scale_ref[...] + bn1_shift_ref[...]
            y = jnp.dot(y, w_l1_ref[...], preferred_element_type=jnp.float32) + b_l1_ref[...]
            y = y * bn2_scale_ref[...] + bn2_shift_ref[...]
            logits = jnp.dot(y, w_l2_ref[...], preferred_element_type=jnp.float32) + b_l2_ref[...]
            m = jnp.max(logits, axis=1, keepdims=True)
            e = jnp.exp(logits - m)
            out_ref[...] = e / jnp.sum(e, axis=1, keepdims=True)

    return kernel


def rnn_model_forward(X, lengths, params, *, time_chunk=32, unroll=4):
    """X: [T, B, I] float32; lengths: [B] int32 (pack_padded_sequence semantics)."""
    T, B, I = X.shape
    H = params["w_hh0_bf"].shape[0]
    G = 4 * H
    H2 = params["w_l1_t"].shape[1]
    C = params["w_l2_t"].shape[1]

    # Pad batch to a full sublane group (>=8) so every vreg row is live.
    Bp = max(8, _pad_to(B, 8))
    Tc = max(1, min(time_chunk, T))
    num_chunks = pl.cdiv(T, Tc)
    Tp = num_chunks * Tc

    lengths = lengths.astype(jnp.int32)
    len_p = jnp.zeros((Bp,), jnp.int32).at[:B].set(lengths)   # padded rows: length 0

    # Phase 1: hoisted, time-independent input projection over the UNPADDED batch
    # (M = T*B rows), bf16 operands / f32 accumulation / bf16 gates out.
    # TODO(synk): when lengths are host-known, clip to T' = max(lengths) timesteps
    # here — gate rows for t >= max_len are never read by Phase 2.
    gates = input_projection(X.reshape(T * B, I).astype(jnp.float32),
                             params["w_ih0_p"], params["b0_p"], G)
    gates = gates.reshape(T, B, G)
    # Pad the (small) gate tensor, not the input of the huge matmul.
    gates_p = jnp.zeros((Tp, Bp, G), jnp.bfloat16).at[:T, :B, :].set(gates)

    maxlen = jnp.max(len_p).astype(jnp.int32).reshape(1)      # robust to unsorted lengths
    len2d = len_p.reshape(Bp, 1)

    kernel = _make_rnn_kernel(Tc, Bp, H, unroll)

    def chunk_map(c, maxlen_ref):
        # Clamp to the last chunk containing a valid timestep: fully padded tail
        # chunks re-use the previous block (no HBM re-fetch) and are skipped.
        last = jnp.maximum((maxlen_ref[0] + Tc - 1) // Tc - 1, 0)
        return (jnp.minimum(c, last), 0, 0)

    const2 = lambda c, maxlen_ref: (0, 0)   # resident weights / outputs: DMA'd once

    # VMEM budget (computed, not guessed): bf16 weights + bf16 gate stream keep this
    # well under v7x's 64 MiB even at H=512.
    # TODO(synk): if this ever gets tight (very large H on v7x), single-buffer the
    # constant-index weight operands with pipeline_mode=pl.Buffered(1).
    vmem_need = (2 * (Tc * Bp * G * 2)            # gate chunk, bf16, double-buffered
                 + 2 * 3 * (H * G * 2)            # resident recurrent weights, bf16
                 + 2 * (H * H2 + H2 * C) * 4      # head matmul weights, f32
                 + 4 * (Bp * H * 4)               # h/c scratch
                 + (2 << 20))                     # biases/BN/lengths/outputs + layout slop
    vmem_limit = int(min(max(2 * vmem_need, 20 << 20), 64 << 20))

    rec_cost = pl.CostEstimate(
        flops=int(2 * Tp * Bp * H * G * 3 + 2 * Bp * H * H2 + 2 * Bp * H2 * C),
        transcendentals=int(Tp * Bp * 10 * H + Bp * C),
        bytes_accessed=int(2 * Tp * Bp * G                    # bf16 gate stream
                           + 2 * 3 * H * G                    # bf16 resident weights
                           + 4 * (H * H2 + H2 * C)            # head weights
                           + 4 * (Bp * (H + C) + 4 * G + 2 * H + 2 * H2 + C)
                           + 4 * Bp),
    )

    # TODO(synk): on v7x (2 TensorCores) and B >= 16, add a leading 'parallel'
    # batch-block grid axis (block Bp/2) so each core carries its own (h, c) scratch.
    out_p, hout_p = pl.pallas_call(
        kernel,
        out_shape=(jax.ShapeDtypeStruct((Bp, C), jnp.float32),
                   jax.ShapeDtypeStruct((Bp, H), jnp.float32)),
        grid_spec=pltpu.PrefetchScalarGridSpec(
            num_scalar_prefetch=1,
            grid=(num_chunks,),
            in_specs=[
                pl.BlockSpec((Tc, Bp, G), chunk_map),     # streamed bf16 gate chunks
                pl.BlockSpec((Bp, 1), const2),            # lengths (mask)
                pl.BlockSpec((H, G), const2),             # w_hh0 (bf16)
                pl.BlockSpec((H, G), const2),             # w_ih1 (bf16)
                pl.BlockSpec((H, G), const2),             # w_hh1 (bf16)
                pl.BlockSpec((1, G), const2),             # b1
                pl.BlockSpec((1, H), const2),             # bn1_scale
                pl.BlockSpec((1, H), const2),             # bn1_shift
                pl.BlockSpec((H, H2), const2),            # w_l1
                pl.BlockSpec((1, H2), const2),            # b_l1
                pl.BlockSpec((1, H2), const2),            # bn2_scale
                pl.BlockSpec((1, H2), const2),             # bn2_shift
                pl.BlockSpec((H2, C), const2),            # w_l2
                pl.BlockSpec((1, C), const2),             # b_l2
            ],
            out_specs=(pl.BlockSpec((Bp, C), const2),
                       pl.BlockSpec((Bp, H), const2)),
            scratch_shapes=[pltpu.VMEM((Bp, H), jnp.float32)] * 4,   # h0, c0, h1, c1
        ),
        compiler_params=pltpu.CompilerParams(
            dimension_semantics=("arbitrary",),            # sequential time carry
            vmem_limit_bytes=vmem_limit,
        ),
        cost_estimate=rec_cost,
    )(maxlen, gates_p, len2d,
      params["w_hh0_bf"], params["w_ih1_bf"], params["w_hh1_bf"], params["b1"],
      params["bn1_scale"], params["bn1_shift"], params["w_l1_t"], params["b_l1"],
      params["bn2_scale"], params["bn2_shift"], params["w_l2_t"], params["b_l2"])

    return out_p[:B], hout_p[:B]


# ----------------------------------------------------------------------------
# Parameters (PyTorch-style init, pre-transposed / pre-padded / pre-cast once)
# ----------------------------------------------------------------------------
def make_params(key, input_size, hidden_size, n_classes=11):
    H, I = hidden_size, input_size
    H2 = int(hidden_size / 2.0)
    G = 4 * H
    k_lstm = 1.0 / np.sqrt(H)
    keys = jax.random.split(key, 12)

    def unif(k, shape, bound):
        return jax.random.uniform(k, shape, jnp.float32, -bound, bound)

    w_ih_l0 = unif(keys[0], (G, I), k_lstm)
    w_hh_l0 = unif(keys[1], (G, H), k_lstm)
    b_ih_l0 = unif(keys[2], (G,), k_lstm)
    b_hh_l0 = unif(keys[3], (G,), k_lstm)
    w_ih_l1 = unif(keys[4], (G, H), k_lstm)
    w_hh_l1 = unif(keys[5], (G, H), k_lstm)
    b_ih_l1 = unif(keys[6], (G,), k_lstm)
    b_hh_l1 = unif(keys[7], (G,), k_lstm)
    k1 = 1.0 / np.sqrt(H)
    w_lin1 = unif(keys[8], (H2, H), k1)
    b_lin1 = unif(keys[9], (H2,), k1)
    k2 = 1.0 / np.sqrt(H2)
    w_lin2 = unif(keys[10], (n_classes, H2), k2)
    b_lin2 = unif(keys[11], (n_classes,), k2)
    # BatchNorm1d (PyTorch defaults), eval-mode stats folded into scale/shift
    eps = 1e-5
    bn1_scale = jnp.ones((H,)) / jnp.sqrt(jnp.ones((H,)) + eps)
    bn1_shift = jnp.zeros((H,))
    bn2_scale = jnp.ones((H2,)) / jnp.sqrt(jnp.ones((H2,)) + eps)
    bn2_shift = jnp.zeros((H2,))

    w_ih0_t = w_ih_l0.T                          # [I, 4H] f32 (reference)
    b0 = (b_ih_l0 + b_hh_l0)[None, :]            # [1, 4H] f32

    # Pre-pad + pre-cast the projection weight ONCE (not per forward call).
    _, _, Kp, Np = _proj_pad_dims(I, G)
    w_ih0_p = jnp.zeros((Kp, Np), jnp.bfloat16).at[:I, :G].set(w_ih0_t.astype(jnp.bfloat16))
    b0_p = jnp.zeros((1, Np), jnp.float32).at[:, :G].set(b0)

    return dict(
        # --- f32 originals (used only by the pure-JAX reference) ---
        w_ih0_t=w_ih0_t, b0=b0,
        w_hh0_t=w_hh_l0.T, w_ih1_t=w_ih_l1.T, w_hh1_t=w_hh_l1.T,
        # --- kernel operands ---
        w_ih0_p=w_ih0_p, b0_p=b0_p,               # padded bf16 weight / f32 bias (Phase 1)
        w_hh0_bf=w_hh_l0.T.astype(jnp.bfloat16),  # [H, 4H] bf16 resident (Phase 2)
        w_ih1_bf=w_ih_l1.T.astype(jnp.bfloat16),
        w_hh1_bf=w_hh_l1.T.astype(jnp.bfloat16),
        b1=(b_ih_l1 + b_hh_l1)[None, :],          # [1, 4H] f32
        bn1_scale=bn1_scale[None, :], bn1_shift=bn1_shift[None, :],
        w_l1_t=w_lin1.T, b_l1=b_lin1[None, :],    # [H, H2], [1, H2]
        bn2_scale=bn2_scale[None, :], bn2_shift=bn2_shift[None, :],
        w_l2_t=w_lin2.T, b_l2=b_lin2[None, :],    # [H2, C], [1, C]
    )


def reference_forward(X, lengths, p):
    """Pure-JAX f32 reference with identical semantics (validation only)."""
    T, B, I = X.shape
    H = p["w_hh0_t"].shape[0]
    h0 = c0 = h1 = c1 = jnp.zeros((B, H), jnp.float32)

    def cell(x, h, c, wih, whh, b):
        g = x @ wih + h @ whh + b
        i, f, gg, o = jnp.split(g, 4, axis=1)
        c = jax.nn.sigmoid(f) * c + jax.nn.sigmoid(i) * jnp.tanh(gg)
        h = jax.nn.sigmoid(o) * jnp.tanh(c)
        return h, c

    for t in range(T):
        mask = (t < lengths)[:, None]
        h0n, c0n = cell(X[t], h0, c0, p["w_ih0_t"], p["w_hh0_t"], p["b0"])
        h1n, c1n = cell(h0n, h1, c1, p["w_ih1_t"], p["w_hh1_t"], p["b1"])
        h0, c0 = jnp.where(mask, h0n, h0), jnp.where(mask, c0n, c0)
        h1, c1 = jnp.where(mask, h1n, h1), jnp.where(mask, c1n, c1)

    y = h1 * p["bn1_scale"] + p["bn1_shift"]
    y = y @ p["w_l1_t"] + p["b_l1"]
    y = y * p["bn2_scale"] + p["bn2_shift"]
    logits = y @ p["w_l2_t"] + p["b_l2"]
    return jax.nn.softmax(logits, axis=1), h1


if __name__ == "__main__":
    # Small shapes consistent with the module (defaults are I=25088, H=512).
    # H is a multiple of 128 so gate slices are lane-aligned; T/time_chunk exercise
    # multi-chunk streaming, tail-chunk skipping (max(lengths) < T) and batch padding.
    T, B, I, H = 24, 2, 256, 128
    key = jax.random.PRNGKey(0)
    k_x, k_p = jax.random.split(key)

    X = jax.random.normal(k_x, (T, B, I), jnp.float32)
    lengths = jnp.array([13, 5], dtype=jnp.int32)   # sorted descending (pack_padded_sequence)
    params = make_params(k_p, I, H)

    output, h_output = rnn_model_forward(X, lengths, params, time_chunk=8, unroll=4)
    jax.block_until_ready((output, h_output))

    ref_out, ref_h = reference_forward(X, lengths, params)
    # bf16 MXU operands (f32 accumulation / f32 gate math) => loosen the f32 tolerance.
    np.testing.assert_allclose(np.asarray(output), np.asarray(ref_out), rtol=5e-2, atol=5e-2)
    np.testing.assert_allclose(np.asarray(h_output), np.asarray(ref_h), rtol=5e-2, atol=5e-2)
    assert output.shape == (B, 11) and h_output.shape == (B, H)
    assert np.isfinite(np.asarray(output)).all() and np.isfinite(np.asarray(h_output)).all()

    print("KERNEL_OK")
</pallas_src>

<mosaic_0001>
module attributes {stable_mosaic.version = 11 : i64} {
  func.func @_proj_kernel(%arg0: i32, %arg1: i32, %arg2: i32, %arg3: memref<48x256xbf16, #tpu.memory_space<vmem>>, %arg4: memref<256x512xbf16, #tpu.memory_space<vmem>>, %arg5: memref<1x512xf32, #tpu.memory_space<vmem>>, %arg6: memref<48x512xbf16, #tpu.memory_space<vmem>>, %arg7: memref<48x512xf32, #tpu.memory_space<vmem>>) attributes {dimension_semantics = [#tpu.dimension_semantics<parallel>, #tpu.dimension_semantics<parallel>, #tpu.dimension_semantics<arbitrary>], iteration_bounds = array<i64: 1, 1, 1>, scalar_prefetch = 0 : i64, scratch_operands = 1 : i64, tpu.core_type = #tpu.core_type<tc>, window_params = [{transform_indices = @transform_0, window_bounds = array<i64: 48, 256>}, {transform_indices = @transform_1, window_bounds = array<i64: 256, 512>}, {transform_indices = @transform_2, window_bounds = array<i64: 1, 512>}, {transform_indices = @transform_3, window_bounds = array<i64: 48, 512>}]} {
    %c0_i32 = arith.constant 0 : i32
    %0 = arith.cmpi eq, %arg2, %c0_i32 : i32
    %1 = arith.extui %0 : i1 to i32
    %c0_i32_0 = arith.constant 0 : i32
    %2 = arith.cmpi ne, %1, %c0_i32_0 : i32
    scf.if %2 {
      %cst_10 = arith.constant 0.000000e+00 : f32
      %12 = vector.broadcast %cst_10 : f32 to vector<48x512xf32>
      %c0_11 = arith.constant 0 : index
      %c0_12 = arith.constant 0 : index
      %13 = vector.load %arg7[%c0_11, %c0_12] : memref<48x512xf32, #tpu.memory_space<vmem>>, vector<48x512xf32>
      tpu.vector_store %arg7[%c0_11, %c0_12], %12 {strides = array<i32>} : memref<48x512xf32, #tpu.memory_space<vmem>>, vector<48x512xf32>,
    } else {
    }
    %c0 = arith.constant 0 : index
    %c0_1 = arith.constant 0 : index
    %3 = vector.load %arg7[%c0, %c0_1] : memref<48x512xf32, #tpu.memory_space<vmem>>, vector<48x512xf32>
    %c0_2 = arith.constant 0 : index
    %c0_3 = arith.constant 0 : index
    %4 = vector.load %arg3[%c0_2, %c0_3] : memref<48x256xbf16, #tpu.memory_space<vmem>>, vector<48x256xbf16>
    %c0_4 = arith.constant 0 : index
    %c0_5 = arith.constant 0 : index
    %5 = vector.load %arg4[%c0_4, %c0_5] : memref<256x512xbf16, #tpu.memory_space<vmem>>, vector<256x512xbf16>
    %cst = arith.constant dense<0.000000e+00> : vector<48x512xf32>
    %6 = tpu.matmul %4, %5, %cst {dimension_numbers = #tpu.dot_dimension_numbers<[1], [0], [0], [1], [0, 0, 1, 1], [], []>} : vector<48x256xbf16>, vector<256x512xbf16>, vector<48x512xf32> -> vector<48x512xf32>
    %7 = arith.addf %3, %6 : vector<48x512xf32>
    %c0_6 = arith.constant 0 : index
    %c0_7 = arith.constant 0 : index
    %8 = vector.load %arg7[%c0_6, %c0_7] : memref<48x512xf32, #tpu.memory_space<vmem>>, vector<48x512xf32>
    tpu.vector_store %arg7[%c0_6, %c0_7], %7 {strides = array<i32>} : memref<48x512xf32, #tpu.memory_space<vmem>>, vector<48x512xf32>,
    %c0_i32_8 = arith.constant 0 : i32
    %9 = arith.cmpi eq, %arg2, %c0_i32_8 : i32
    %10 = arith.extui %9 : i1 to i32
    %c0_i32_9 = arith.constant 0 : i32
    %11 = arith.cmpi ne, %10, %c0_i32_9 : i32
    scf.if %11 {
      %c0_10 = arith.constant 0 : index
      %c0_11 = arith.constant 0 : index
      %12 = vector.load %arg7[%c0_10, %c0_11] : memref<48x512xf32, #tpu.memory_space<vmem>>, vector<48x512xf32>
      %c0_12 = arith.constant 0 : index
      %c0_13 = arith.constant 0 : index
      %13 = vector.load %arg5[%c0_12, %c0_13] : memref<1x512xf32, #tpu.memory_space<vmem>>, vector<1x512xf32>
      %14 = vector.broadcast %13 : vector<1x512xf32> to vector<48x512xf32>
      %15 = arith.addf %12, %14 : vector<48x512xf32>
      %16 = arith.truncf %15 : vector<48x512xf32> to vector<48x512xbf16>
      %c0_14 = arith.constant 0 : index
      %c0_15 = arith.constant 0 : index
      %17 = vector.load %arg6[%c0_14, %c0_15] : memref<48x512xbf16, #tpu.memory_space<vmem>>, vector<48x512xbf16>
      tpu.vector_store %arg6[%c0_14, %c0_15], %16 {strides = array<i32>} : memref<48x512xbf16, #tpu.memory_space<vmem>>, vector<48x512xbf16>,
    } else {
    }
    return
  }
  func.func @transform_0(%arg0: i32, %arg1: i32, %arg2: i32) -> (i32, i32) {
    %c0_i32 = arith.constant 0 : i32
    return %arg0, %arg2 : i32, i32
  }
  func.func @transform_1(%arg0: i32, %arg1: i32, %arg2: i32) -> (i32, i32) {
    %c0_i32 = arith.constant 0 : i32
    return %arg2, %arg1 : i32, i32
  }
  func.func @transform_2(%arg0: i32, %arg1: i32, %arg2: i32) -> (i32, i32) {
    %c0_i32 = arith.constant 0 : i32
    %c0_i32_0 = arith.constant 0 : i32
    return %c0_i32, %arg1 : i32, i32
  }
  func.func @transform_3(%arg0: i32, %arg1: i32, %arg2: i32) -> (i32, i32) {
    %c0_i32 = arith.constant 0 : i32
    return %arg0, %arg1 : i32, i32
  }
}

</mosaic_0001>

<bundles_post_ra>
// kernel: tpu_custom_call.1
= control target key start
LH: loop header
LB: loop body
LE: loop exit
PB: predicated region body
PF: predicated region fallthrough
CT: control target
= control target key end

     0   :  { %8 = vsyncpa [#allocation4], 0  ;;  %s1230_s0 = inlined_call_operand.hbm [shape: bf16[48,256], index: 0, kind: input, shape index: {}]   ;;  %s1231_s1 = inlined_call_operand.hbm [shape: bf16[256,512], index: 1, kind: input, shape index: {}]   ;;  %s1232_s2 = inlined_call_operand.vmem [shape: f32[1,512], index: 2, kind: input, shape index: {}]   ;;  %s1233_s3 = inlined_call_operand.hbm [shape: bf16[48,512], index: 3, kind: output, shape index: {}]  }
   0x1   :  { %9 = vsyncpa [#allocation7], 0 }
   0x2   :  { %10 = vsyncpa [#allocation5], 0  ;;  %s1142_s12 = smov [#allocation3]   ;;  %s1070_s16 = scalar_lea.hbm %s1230_s0, 768 }
   0x3   :  { %s16_s13 = sshll.u32 %s1142_s12, 4  ;;  %p1071_p0 = scmp.ne.s32.totalorder %s1230_s0, %s1070_s16  ;;  %s17_s13 = int_to_ptr.vmem [resolvable:$true] %s16_s13 }
   0x4   :  { %p1074_p1 = scmp.lt.u32.totalorder %s1070_s16, %s1230_s0 }
   0x6   :  { %p1076_p2 = pnand %p1074_p1, %p1071_p0 }
   0x8   :  { %1079 = shalt.err (!%p1076_p2)
}
   0x9   :  { %s1080_s21 = scalar_lea.vmem %s17_s13, 768  ;;  %p1085_p4 = scmp.lt.s32.totalorder %s17_s13, %s17_s13 }
   0xa   :  { %p1081_p3 = scmp.ne.s32.totalorder %s17_s13, %s1080_s21  ;;  %p1086_p5 = scmp.lt.s32.totalorder %s1080_s21, %s1080_s21 }
   0xc   :  { %p1087_p6 = por %p1086_p5, %p1085_p4 }
   0xe   :  { %p1088_p7 = pnand %p1087_p6, %p1081_p3 }
  0x10   :  { %1091 = shalt.err (!%p1088_p7)
}
  0x11   :  { %s1143_s22 = smov 128   ;;  %s1144_s23 = smov 8  }
  0x12   :  { %22 = dma.hbm_to_vmem [thread:$0]  %s1230_s0, 768, %s17_s13, [#allocation4], %s1143_s22, %s1143_s22, %s1144_s23  }
  0x13   :  { %s1145_s26 = smov [#allocation6]   ;;  %s1092_s30 = scalar_lea.hbm %s1231_s1, 8192 }
  0x14   :  { %s28_s27 = sshll.u32 %s1145_s26, 4  ;;  %p1093_p8 = scmp.ne.s32.totalorder %s1231_s1, %s1092_s30  ;;  %s29_s27 = int_to_ptr.vmem [resolvable:$true] %s28_s27 }
  0x15   :  { %p1096_p9 = scmp.lt.u32.totalorder %s1092_s30, %s1231_s1 }
  0x17   :  { %p1098_p10 = pnand %p1096_p9, %p1093_p8 }
  0x19   :  { %1101 = shalt.err (!%p1098_p10)
}
  0x1a   :  { %s1102_s8 = scalar_lea.vmem %s29_s27, 8192  ;;  %p1107_p12 = scmp.lt.s32.totalorder %s29_s27, %s29_s27 }
  0x1b   :  { %p1103_p11 = scmp.ne.s32.totalorder %s29_s27, %s1102_s8  ;;  %p1108_p13 = scmp.lt.s32.totalorder %s1102_s8, %s1102_s8 }
  0x1d   :  { %p1109_p0 = por %p1108_p13, %p1107_p12 }
  0x1f   :  { %p1110_p1 = pnand %p1109_p0, %p1103_p11 }
  0x21   :  { %1113 = shalt.err (!%p1110_p1)
}
  0x22   :  { %s1146_s0 = smov 256   ;;  %s1147_s9 = smov 16  }
  0x23   :  { %34 = dma.hbm_to_vmem [thread:$0]  %s1231_s1, 8192, %s29_s27, [#allocation7], %s1146_s0, %s1146_s0, %s1147_s9  }
  0x24   :  { %1136 = dma.done.wait [#allocation4], 768  }
  0x25   :  { %1137 = vsyncadd [#allocation4], 4294966528 }
  0x26   :  { %1138 = dma.done.wait [#allocation7], 8192  }
  0x27   :  { %1139 = vsyncadd [#allocation7], 4294959104  ;;  %v965_v0 = vld [vmem:[#allocation6 + $0x4] ss:$16 sps:$4 sm:$0xff]   ;;  %v967_v1 = vld [vmem:[#allocation6 + $0xc] ss:$16 sps:$4 sm:$0xff]  }
  0x28   :  { %515 = vmatprep.subr.bf16.mxu0 %v965_v0  ;;  %v969_v2 = vld [vmem:[#allocation6] ss:$16 sps:$4 sm:$0xff]   ;;  %v970_v3 = vld [vmem:[#allocation6 + $0x8] ss:$16 sps:$4 sm:$0xff]   ;;  %578 = vmatprep.subr.bf16.mxu1 %v967_v1  ;;  %v971_v4 = vld [vmem:[#allocation6 + $0x24] ss:$16 sps:$4 sm:$0xff]  }
  0x29   :  { %516 = vmatpush1.bf16.msra.mxu0 %v969_v2  ;;  %579 = vmatpush1.bf16.msra.mxu1 %v970_v3  ;;  %v973_v5 = vld [vmem:[#allocation6 + $0x2c] ss:$16 sps:$4 sm:$0xff]   ;;  %v975_v6 = vld [vmem:[#allocation6 + $0x20] ss:$16 sps:$4 sm:$0xff]   ;;  %v976_v7 = vld [vmem:[#allocation6 + $0x28] ss:$16 sps:$4 sm:$0xff]  }
  0x2a   :  { %517 = vmatprep.subr.bf16.mxu0 %v971_v4  ;;  %580 = vmatprep.subr.bf16.mxu1 %v973_v5  ;;  %v977_v8 = vld [vmem:[#allocation6 + $0x44] ss:$16 sps:$4 sm:$0xff]   ;;  %v979_v9 = vld [vmem:[#allocation6 + $0x4c] ss:$16 sps:$4 sm:$0xff]   ;;  %v981_v10 = vld [vmem:[#allocation6 + $0x40] ss:$16 sps:$4 sm:$0xff]  }
  0x2b   :  { %v982_v11 = vld [vmem:[#allocation6 + $0x48] ss:$16 sps:$4 sm:$0xff]   ;;  %v983_v12 = vld [vmem:[#allocation6 + $0x64] ss:$16 sps:$4 sm:$0xff]   ;;  %v985_v13 = vld [vmem:[#allocation6 + $0x6c] ss:$16 sps:$4 sm:$0xff]  }
  0x2c   :  { %v987_v14 = vld [vmem:[#allocation6 + $0x60] ss:$16 sps:$4 sm:$0xff]   ;;  %v988_v15 = vld [vmem:[#allocation6 + $0x68] ss:$16 sps:$4 sm:$0xff]   ;;  %v989_v16 = vld [vmem:[#allocation6 + $0x84] ss:$16 sps:$4 sm:$0xff]  }
  0x2d   :  { %518 = vmatpush1.bf16.msra.mxu0 %v975_v6  ;;  %581 = vmatpush1.bf16.msra.mxu1 %v976_v7  ;;  %v991_v17 = vld [vmem:[#allocation6 + $0x8c] ss:$16 sps:$4 sm:$0xff]   ;;  %v993_v18 = vld [vmem:[#allocation6 + $0x80] ss:$16 sps:$4 sm:$0xff]   ;;  %v994_v19 = vld [vmem:[#allocation6 + $0x88] ss:$16 sps:$4 sm:$0xff]   ;;  %v718_v6 = vlaneseq }
  0x2e   :  { %519 = vmatprep.subr.bf16.mxu0 %v977_v8  ;;  %582 = vmatprep.subr.bf16.mxu1 %v979_v9  ;;  %v995_v20 = vld [vmem:[#allocation6 + $0xa4] ss:$16 sps:$4 sm:$0xff]   ;;  %v997_v21 = vld [vmem:[#allocation6 + $0xac] ss:$16 sps:$4 sm:$0xff]   ;;  %v999_v22 = vld [vmem:[#allocation6 + $0xa0] ss:$16 sps:$4 sm:$0xff]  }
  0x2f   :  { %v1000_v23 = vld [vmem:[#allocation6 + $0xa8] ss:$16 sps:$4 sm:$0xff]   ;;  %v1001_v24 = vld [vmem:[#allocation6 + $0xc4] ss:$16 sps:$4 sm:$0xff]   ;;  %v1003_v25 = vld [vmem:[#allocation6 + $0xcc] ss:$16 sps:$4 sm:$0xff]  }
  0x30   :  { %v1005_v26 = vld [vmem:[#allocation6 + $0xc0] ss:$16 sps:$4 sm:$0xff]   ;;  %v1006_v27 = vld [vmem:[#allocation6 + $0xc8] ss:$16 sps:$4 sm:$0xff]   ;;  %v1007_v28 = vld [vmem:[#allocation6 + $0xe4] ss:$16 sps:$4 sm:$0xff]  }
  0x31   :  { %520 = vmatpush1.bf16.msra.mxu0 %v981_v10  ;;  %583 = vmatpush1.bf16.msra.mxu1 %v982_v11  ;;  %v1009_v29 = vld [vmem:[#allocation6 + $0xec] ss:$16 sps:$4 sm:$0xff]   ;;  %v1011_v30 = vld [vmem:[#allocation6 + $0xe0] ss:$16 sps:$4 sm:$0xff]   ;;  %v1012_v31 = vld [vmem:[#allocation6 + $0xe8] ss:$16 sps:$4 sm:$0xff]  }
  0x32   :  { %521 = vmatprep.subr.bf16.mxu0 %v983_v12  ;;  %584 = vmatprep.subr.bf16.mxu1 %v985_v13  ;;  %v1013_v32 = vld [vmem:[#allocation6 + $0x104] ss:$16 sps:$4 sm:$0xff]   ;;  %v1015_v33 = vld [vmem:[#allocation6 + $0x10c] ss:$16 sps:$4 sm:$0xff]   ;;  %v1017_v34 = vld [vmem:[#allocation6 + $0x100] ss:$16 sps:$4 sm:$0xff]  }
  0x33   :  { %v1018_v35 = vld [vmem:[#allocation6 + $0x108] ss:$16 sps:$4 sm:$0xff]   ;;  %v1019_v36 = vld [vmem:[#allocation6 + $0x124] ss:$16 sps:$4 sm:$0xff]   ;;  %v1021_v37 = vld [vmem:[#allocation6 + $0x12c] ss:$16 sps:$4 sm:$0xff]  }
  0x34   :  { %v1023_v38 = vld [vmem:[#allocation6 + $0x120] ss:$16 sps:$4 sm:$0xff]   ;;  %v1024_v39 = vld [vmem:[#allocation6 + $0x128] ss:$16 sps:$4 sm:$0xff]   ;;  %v1025_v40 = vld [vmem:[#allocation6 + $0x144] ss:$16 sps:$4 sm:$0xff]  }
  0x35   :  { %522 = vmatpush1.bf16.msra.mxu0 %v987_v14  ;;  %585 = vmatpush1.bf16.msra.mxu1 %v988_v15  ;;  %v1027_v41 = vld [vmem:[#allocation6 + $0x14c] ss:$16 sps:$4 sm:$0xff]   ;;  %v1029_v42 = vld [vmem:[#allocation6 + $0x140] ss:$16 sps:$4 sm:$0xff]   ;;  %v1030_v43 = vld [vmem:[#allocation6 + $0x148] ss:$16 sps:$4 sm:$0xff]  }
  0x36   :  { %523 = vmatprep.subr.bf16.mxu0 %v989_v16  ;;  %586 = vmatprep.subr.bf16.mxu1 %v991_v17  ;;  %v1031_v44 = vld [vmem:[#allocation6 + $0x164] ss:$16 sps:$4 sm:$0xff]   ;;  %v1033_v45 = vld [vmem:[#allocation6 + $0x16c] ss:$16 sps:$4 sm:$0xff]   ;;  %v1035_v46 = vld [vmem:[#allocation6 + $0x160] ss:$16 sps:$4 sm:$0xff]  }
  0x37   :  { %v1036_v47 = vld [vmem:[#allocation6 + $0x168] ss:$16 sps:$4 sm:$0xff]   ;;  %v1063_v48 = vld [vmem:[#allocation3 + $0x4] ss:$8 sps:$4 sm:$0xff]   ;;  %v1041_v51 = vld [vmem:[#allocation6 + $0x180] ss:$16 sps:$4 sm:$0xff]  }
  0x38   :  { %v1037_v49 = vld [vmem:[#allocation6 + $0x184] ss:$16 sps:$4 sm:$0xff]   ;;  %v1039_v50 = vld [vmem:[#allocation6 + $0x18c] ss:$16 sps:$4 sm:$0xff]   ;;  %547 = vmatprep.mubr.bf16.mxu0 %v1063_v48  ;;  %610 = vmatprep.mubr.bf16.mxu1 %v1063_v48  ;;  %v1042_v52 = vld [vmem:[#allocation6 + $0x188] ss:$16 sps:$4 sm:$0xff]  }
  0x39   :  { %524 = vmatpush1.bf16.msra.mxu0 %v993_v18  ;;  %587 = vmatpush1.bf16.msra.mxu1 %v994_v19  ;;  %v1043_v53 = vld [vmem:[#allocation6 + $0x1a4] ss:$16 sps:$4 sm:$0xff]   ;;  %v1045_v54 = vld [vmem:[#allocation6 + $0x1ac] ss:$16 sps:$4 sm:$0xff]   ;;  %v1047_v55 = vld [vmem:[#allocation6 + $0x1a0] ss:$16 sps:$4 sm:$0xff]  }
  0x3a   :  { %525 = vmatprep.subr.bf16.mxu0 %v995_v20  ;;  %588 = vmatprep.subr.bf16.mxu1 %v997_v21  ;;  %v1048_v56 = vld [vmem:[#allocation6 + $0x1a8] ss:$16 sps:$4 sm:$0xff]   ;;  %v1049_v57 = vld [vmem:[#allocation6 + $0x1c4] ss:$16 sps:$4 sm:$0xff]   ;;  %v1051_v58 = vld [vmem:[#allocation6 + $0x1cc] ss:$16 sps:$4 sm:$0xff]  }
  0x3b   :  { %v1053_v59 = vld [vmem:[#allocation6 + $0x1c0] ss:$16 sps:$4 sm:$0xff]   ;;  %v1054_v60 = vld [vmem:[#allocation6 + $0x1c8] ss:$16 sps:$4 sm:$0xff]   ;;  %v1055_v61 = vld [vmem:[#allocation6 + $0x1e4] ss:$16 sps:$4 sm:$0xff]  }
  0x3c   :  { %v1057_v62 = vld [vmem:[#allocation6 + $0x1ec] ss:$16 sps:$4 sm:$0xff]   ;;  %v1059_v63 = vld [vmem:[#allocation6 + $0x1e0] ss:$16 sps:$4 sm:$0xff]   ;;  %v1060_v0 = vld [vmem:[#allocation6 + $0x1e8] ss:$16 sps:$4 sm:$0xff]  }
  0x3d   :  { %526 = vmatpush1.bf16.msra.mxu0 %v999_v22  ;;  %589 = vmatpush1.bf16.msra.mxu1 %v1000_v23  ;;  %v1061_v1 = vld [vmem:[#allocation3] ss:$8 sps:$4 sm:$0xff]   ;;  %v1064_v2 = vld [vmem:[#allocation3 + $0x14] ss:$8 sps:$4 sm:$0xff]   ;;  %v1066_v3 = vld [vmem:[#allocation3 + $0x10] ss:$8 sps:$4 sm:$0xff]  }
  0x3e   :  { %527 = vmatprep.subr.bf16.mxu0 %v1001_v24  ;;  %590 = vmatprep.subr.bf16.mxu1 %v1003_v25  ;;  %v1067_v4 = vld [vmem:[#allocation3 + $0x24] ss:$8 sps:$4 sm:$0xff]   ;;  %v1069_v5 = vld [vmem:[#allocation3 + $0x20] ss:$8 sps:$4 sm:$0xff]   ;;  %v719_v7 = vshrl.u32 %v718_v6, 7 }
  0x3f   :  { %v716_v10 = vld [vmem:[%s1232_s2] sm:$0xf]  ;;  %s1148_s2 = smov [#allocation8]  }
  0x40   :  { %v720_v8 = vsub.s32 0, %v719_v7  ;;  %v728_v9 = vsub.s32 2, %v719_v7  ;;  %v724_v11 = vsub.s32 1, %v719_v7  ;;  %v732_v12 = vsub.s32 3, %v719_v7  ;;  %s851_s13 = sshll.u32 %s1148_s2, 4  ;;  %s852_s13 = int_to_ptr.vmem [resolvable:$true] %s851_s13 }
  0x41   :  { %528 = vmatpush1.bf16.msra.mxu0 %v1005_v26  ;;  %591 = vmatpush1.bf16.msra.mxu1 %v1006_v27  ;;  %s1114_s14 = scalar_lea.vmem %s852_s13, 1536  ;;  %p1119_p3 = scmp.lt.s32.totalorder %s852_s13, %s852_s13 }
  0x42   :  { %529 = vmatprep.subr.bf16.mxu0 %v1007_v28  ;;  %592 = vmatprep.subr.bf16.mxu1 %v1009_v29  ;;  %v721_v13 = vrot.slane %v716_v10, %v720_v8  ;;  %v729_v14 = vrot.slane %v716_v10, %v728_v9  ;;  %v1199_v15 = vrot.slane %v716_v10, %v724_v11  ;;  %p1115_p2 = scmp.ne.s32.totalorder %s852_s13, %s1114_s14  ;;  %p1120_p4 = scmp.lt.s32.totalorder %s1114_s14, %s1114_s14 }
  0x43   :  { %v1201_v16 = vrot.slane %v716_v10, %v732_v12 }
  0x44   :  { %p1121_p5 = por %p1120_p4, %p1119_p3 }
  0x45   :  { %530 = vmatpush1.bf16.msra.mxu0 %v1011_v30  ;;  %593 = vmatpush1.bf16.msra.mxu1 %v1012_v31 }
  0x46   :  { %531 = vmatprep.subr.bf16.mxu0 %v1013_v32  ;;  %594 = vmatprep.subr.bf16.mxu1 %v1015_v33  ;;  %p1122_p6 = pnand %p1121_p5, %p1115_p2 }
  0x49   :  { %532 = vmatpush1.bf16.msra.mxu0 %v1017_v34  ;;  %595 = vmatpush1.bf16.msra.mxu1 %v1018_v35 }
  0x4a   :  { %533 = vmatprep.subr.bf16.mxu0 %v1019_v36  ;;  %596 = vmatprep.subr.bf16.mxu1 %v1021_v37 }
  0x4d   :  { %534 = vmatpush1.bf16.msra.mxu0 %v1023_v38  ;;  %597 = vmatpush1.bf16.msra.mxu1 %v1024_v39 }
  0x4e   :  { %535 = vmatprep.subr.bf16.mxu0 %v1025_v40  ;;  %598 = vmatprep.subr.bf16.mxu1 %v1027_v41 }
  0x51   :  { %536 = vmatpush1.bf16.msra.mxu0 %v1029_v42  ;;  %599 = vmatpush1.bf16.msra.mxu1 %v1030_v43 }
  0x52   :  { %537 = vmatprep.subr.bf16.mxu0 %v1031_v44  ;;  %600 = vmatprep.subr.bf16.mxu1 %v1033_v45 }
  0x55   :  { %538 = vmatpush1.bf16.msra.mxu0 %v1035_v46  ;;  %601 = vmatpush1.bf16.msra.mxu1 %v1036_v47 }
  0x56   :  { %539 = vmatprep.subr.bf16.mxu0 %v1037_v49  ;;  %602 = vmatprep.subr.bf16.mxu1 %v1039_v50 }
  0x59   :  { %540 = vmatpush1.bf16.msra.mxu0 %v1041_v51  ;;  %603 = vmatpush1.bf16.msra.mxu1 %v1042_v52 }
  0x5a   :  { %541 = vmatprep.subr.bf16.mxu0 %v1043_v53  ;;  %604 = vmatprep.subr.bf16.mxu1 %v1045_v54 }
  0x5d   :  { %542 = vmatpush1.bf16.msra.mxu0 %v1047_v55  ;;  %605 = vmatpush1.bf16.msra.mxu1 %v1048_v56 }
  0x5e   :  { %543 = vmatprep.subr.bf16.mxu0 %v1049_v57  ;;  %606 = vmatprep.subr.bf16.mxu1 %v1051_v58 }
  0x61   :  { %544 = vmatpush1.bf16.msra.mxu0 %v1053_v59  ;;  %607 = vmatpush1.bf16.msra.mxu1 %v1054_v60 }
  0x62   :  { %545 = vmatprep.subr.bf16.mxu0 %v1055_v61  ;;  %608 = vmatprep.subr.bf16.mxu1 %v1057_v62 }
  0x65   :  { %546 = vmatpush1.bf16.msra.mxu0 %v1059_v63  ;;  %609 = vmatpush1.bf16.msra.mxu1 %v1060_v0 }
  0x68   :  { %548 = vmatmul.mubr.bf16.vlgmr.msra.gmra.mrb[0].mxu0 %v1061_v1  ;;  %611 = vmatmul.mubr.bf16.vlgmr.msra.gmra.mrb[0].mxu1 %v1061_v1 }
  0x69   :  { %557 = vmatprep.mubr.bf16.mxu0 %v1064_v2  ;;  %620 = vmatprep.mubr.bf16.mxu1 %v1064_v2 }
  0x70   :  { %558 = vmatmul.mubr.bf16.gmra.mrb[4].mxu0 %v1066_v3  ;;  %621 = vmatmul.mubr.bf16.gmra.mrb[4].mxu1 %v1066_v3 }
  0x71   :  { %567 = vmatprep.mubr.bf16.mxu0 %v1067_v4  ;;  %630 = vmatprep.mubr.bf16.mxu1 %v1067_v4 }
  0x78   :  { %568 = vmatmul.mubr.bf16.gmra.mrb[8].mxu0 %v1069_v5  ;;  %631 = vmatmul.mubr.bf16.gmra.mrb[8].mxu1 %v1069_v5 }
 0x13b   :  { %v549_v17 = vpop.f32.mrb[0].mxu0  ;;  %v612_v18 = vpop.f32.mrb[0].mxu1 }
 0x13c   :  { %v738_v19 = vadd.f32 %v721_v13, %v549_v17  ;;  %v740_v20 = vadd.f32 %v729_v14, %v612_v18  ;;  %v551_v21 = vpop.f32.mrb[1].mxu0  ;;  %v614_v22 = vpop.f32.mrb[1].mxu1 }
 0x13d   :  { %v739_v23 = vadd.f32 %v1199_v15, %v551_v21  ;;  %v741_v24 = vadd.f32 %v1201_v16, %v614_v22  ;;  %v553_v25 = vpop.f32.mrb[2].mxu0  ;;  %v616_v26 = vpop.f32.mrb[2].mxu1 }
 0x13e   :  { %v742_v27 = vadd.f32 %v721_v13, %v553_v25  ;;  %v744_v28 = vadd.f32 %v729_v14, %v616_v26  ;;  %v555_v29 = vpop.f32.mrb[3].mxu0  ;;  %v618_v30 = vpop.f32.mrb[3].mxu1 }
 0x13f   :  { %v946_v31 = vpack.c.bf16 %v739_v23, %v738_v19  ;;  %v947_v32 = vpack.c.bf16 %v741_v24, %v740_v20  ;;  %v743_v33 = vadd.f32 %v1199_v15, %v555_v29  ;;  %v745_v34 = vadd.f32 %v1201_v16, %v618_v30 }
 0x141   :  { %834 = vst [vmem:[#allocation8] sm:$0xff] %v946_v31  ;;  %835 = vst [vmem:[#allocation8 + $0x8] sm:$0xff] %v947_v32  ;;  %v948_v35 = vpack.c.bf16 %v743_v33, %v742_v27  ;;  %v949_v36 = vpack.c.bf16 %v745_v34, %v744_v28 }
 0x143   :  { %836 = vst [vmem:[#allocation8 + $0x10] sm:$0xff] %v948_v35  ;;  %837 = vst [vmem:[#allocation8 + $0x18] sm:$0xff] %v949_v36  ;;  %v559_v37 = vpop.f32.mrb[4].mxu0  ;;  %v622_v38 = vpop.f32.mrb[4].mxu1 }
 0x144   :  { %v746_v39 = vadd.f32 %v721_v13, %v559_v37  ;;  %v748_v40 = vadd.f32 %v729_v14, %v622_v38  ;;  %v561_v41 = vpop.f32.mrb[5].mxu0  ;;  %v624_v42 = vpop.f32.mrb[5].mxu1 }
 0x145   :  { %v747_v43 = vadd.f32 %v1199_v15, %v561_v41  ;;  %v749_v44 = vadd.f32 %v1201_v16, %v624_v42  ;;  %v563_v45 = vpop.f32.mrb[6].mxu0  ;;  %v626_v46 = vpop.f32.mrb[6].mxu1 }
 0x146   :  { %v750_v47 = vadd.f32 %v721_v13, %v563_v45  ;;  %v752_v48 = vadd.f32 %v729_v14, %v626_v46  ;;  %v565_v49 = vpop.f32.mrb[7].mxu0  ;;  %v628_v50 = vpop.f32.mrb[7].mxu1 }
 0x147   :  { %v950_v51 = vpack.c.bf16 %v747_v43, %v746_v39  ;;  %v951_v52 = vpack.c.bf16 %v749_v44, %v748_v40  ;;  %v751_v53 = vadd.f32 %v1199_v15, %v565_v49  ;;  %v753_v54 = vadd.f32 %v1201_v16, %v628_v50 }
 0x149   :  { %838 = vst [vmem:[#allocation8 + $0x20] sm:$0xff] %v950_v51  ;;  %839 = vst [vmem:[#allocation8 + $0x28] sm:$0xff] %v951_v52  ;;  %v952_v55 = vpack.c.bf16 %v751_v53, %v750_v47  ;;  %v953_v56 = vpack.c.bf16 %v753_v54, %v752_v48 }
 0x14b   :  { %840 = vst [vmem:[#allocation8 + $0x30] sm:$0xff] %v952_v55  ;;  %841 = vst [vmem:[#allocation8 + $0x38] sm:$0xff] %v953_v56  ;;  %v569_v57 = vpop.f32.mrb[8].mxu0  ;;  %v632_v58 = vpop.f32.mrb[8].mxu1 }
 0x14c   :  { %v754_v59 = vadd.f32 %v721_v13, %v569_v57  ;;  %v756_v60 = vadd.f32 %v729_v14, %v632_v58  ;;  %v571_v61 = vpop.f32.mrb[9].mxu0  ;;  %v634_v62 = vpop.f32.mrb[9].mxu1 }
 0x14d   :  { %v755_v63 = vadd.f32 %v1199_v15, %v571_v61  ;;  %v757_v0 = vadd.f32 %v1201_v16, %v634_v62  ;;  %v573_v1 = vpop.f32.mrb[10].mxu0  ;;  %v636_v2 = vpop.f32.mrb[10].mxu1 }
 0x14e   :  { %v758_v3 = vadd.f32 %v721_v13, %v573_v1  ;;  %v760_v4 = vadd.f32 %v729_v14, %v636_v2  ;;  %v575_v5 = vpop.f32.mrb[11].mxu0  ;;  %v638_v6 = vpop.f32.mrb[11].mxu1 }
 0x14f   :  { %v954_v7 = vpack.c.bf16 %v755_v63, %v754_v59  ;;  %v955_v8 = vpack.c.bf16 %v757_v0, %v756_v60  ;;  %v759_v9 = vadd.f32 %v1199_v15, %v575_v5  ;;  %v761_v10 = vadd.f32 %v1201_v16, %v638_v6 }
 0x151   :  { %842 = vst [vmem:[#allocation8 + $0x40] sm:$0xff] %v954_v7  ;;  %843 = vst [vmem:[#allocation8 + $0x48] sm:$0xff] %v955_v8  ;;  %v956_v11 = vpack.c.bf16 %v759_v9, %v758_v3  ;;  %v957_v12 = vpack.c.bf16 %v761_v10, %v760_v4 }
 0x153   :  { %844 = vst [vmem:[#allocation8 + $0x50] sm:$0xff] %v956_v11  ;;  %845 = vst [vmem:[#allocation8 + $0x58] sm:$0xff] %v957_v12 }
 0x154   :  { %1125 = shalt.err (!%p1122_p6)
}
 0x155   :  { %s1126_s17 = scalar_lea.hbm %s1233_s3, 1536 }
 0x156   :  { %p1127_p7 = scmp.ne.s32.totalorder %s1233_s3, %s1126_s17  ;;  %p1130_p8 = scmp.lt.u32.totalorder %s1126_s17, %s1233_s3 }
 0x158   :  { %p1132_p9 = pnand %p1130_p8, %p1127_p7 }
 0x15a   :  { %1135 = shalt.err (!%p1132_p9)
}
 0x15b   :  { %857 = dma.vmem_to_hbm [thread:$0]  %s852_s13, 1536, %s1233_s3, [#allocation5], %s1146_s0, %s1146_s0, %s1147_s9  }
 0x15c   :  { %1140 = dma.done.wait [#allocation5], 1536  }
 0x15d   :  { %1141 = vsyncadd [#allocation5], 4294965760 }
 0x15e   :  { %861 = vsyncpa [#allocation4], 1 }
 0x15f   :  { %862 = vsyncpa [#allocation7], 1 }
 0x160   :  { %863 = vsyncpa [#allocation5], 1 }

</bundles_post_ra>
